<compile_context>
chip_gen: v5e
topology: v5e:2x2
jax: 0.10.0
libtpu: 0.0.40
codegen_flags: <defaults>
</compile_context>

<pallas_src>
import functools

import jax
import jax.numpy as jnp
from jax.experimental import pallas as pl
from jax.experimental.pallas import tpu as pltpu


def decoder_kernel(z_ref, w1_ref, b1_ref, w2_ref, b2_ref, out_ref):
    # Two MXU matmuls (f32 accumulate); bias adds + ReLU are free VPU filler.
    h = jnp.dot(z_ref[...], w1_ref[...], preferred_element_type=jnp.float32)
    h = jnp.maximum(h + b1_ref[...], 0.0)                     # ReLU, f32 epilogue
    h = h.astype(w2_ref.dtype)                                # no-op on the f32 path
    out = jnp.dot(h, w2_ref[...], preferred_element_type=jnp.float32)
    out_ref[...] = (out + b2_ref[...]).astype(out_ref.dtype)


def _round_up(x, m):
    return ((x + m - 1) // m) * m


def _cdiv(a, b):
    return -(-a // b)


def prepare_decoder_params(w1, b1, w2, b2, *, use_bf16=False):
    """One-time prep (call OUTSIDE the per-step jitted path).

    Accepts PyTorch nn.Linear layouts: w1 [H, L], b1 [H], w2 [O, H], b2 [O].
    Returns (w1_t [L, H], b1 [1, H], w2_t [H, O], b2 [1, O]).
    `use_bf16=True` casts the weight matrices to bf16 for the MXU (f32
    accumulate is kept in the kernel); biases stay f32 for the VPU epilogue
    (v5e has no bf16 VPU support).
    """
    mm_dtype = jnp.bfloat16 if use_bf16 else jnp.float32
    w1_t = jnp.asarray(w1, jnp.float32).T.astype(mm_dtype)    # [L, H]
    w2_t = jnp.asarray(w2, jnp.float32).T.astype(mm_dtype)    # [H, O]
    b1_r = jnp.asarray(b1, jnp.float32).reshape(1, -1)        # [1, H]
    b2_r = jnp.asarray(b2, jnp.float32).reshape(1, -1)        # [1, O]
    return w1_t, b1_r, w2_t, b2_r


@functools.partial(jax.jit, static_argnames=("block_b",))
def decoder_forward(z, w1, b1, w2, b2, *, block_b=1024):
    """z: [B, L]; w1: [L, H]; b1: [1, H]; w2: [H, O]; b2: [1, O] -> y: [B, O]."""
    B, L = z.shape
    H = w1.shape[1]
    O = w2.shape[1]
    mm_dtype = w1.dtype
    z_mm = z.astype(mm_dtype)                                  # no-op on f32 path

    SUB = 8
    B_r = _round_up(max(B, SUB), SUB)
    # v7x: for batches >= 16 cap the tile at ceil(B/2) so grid >= 2 and the
    # "parallel" batch axis actually shards across both TensorCores.
    half = _round_up(_cdiv(B_r, 2), SUB) if B_r >= 16 else B_r
    Bt = max(SUB, min(_round_up(block_b, SUB), half))
    Bp = _round_up(B_r, Bt)
    grid = (Bp // Bt,)

    if Bp != B:
        # Only wrapper op left; exact: padded rows are sliced away below.
        z_mm = jnp.zeros((Bp, L), mm_dtype).at[:B].set(z_mm)

    itemsize = jnp.dtype(mm_dtype).itemsize
    flops = 2 * B * (L * H + H * O)
    bytes_accessed = itemsize * (B * L + L * H + H * O) + 4 * (H + O + B * O)

    # VMEM budget: resident weights/biases + double-buffered z/out tiles.
    resident = itemsize * (L * H + H * O) + 4 * (H + O)
    streaming = 2 * (itemsize * Bt * L + 4 * Bt * O)
    vmem_needed = resident + streaming
    # TODO(synk): a scaled-up decoder (e.g. H>=2048, O>=3072) can exceed v7x's
    # 32 MiB scoped / 64 MiB physical VMEM with fully resident weights; in that
    # regime tile the second matmul over H (VMEM f32 accumulator + pl.when
    # init/finalize) or over O instead of keeping both weights resident.
    vmem_limit = int(min(max(2 * vmem_needed, 32 * 1024 * 1024),
                         100 * 1024 * 1024))

    out_p = pl.pallas_call(
        decoder_kernel,
        out_shape=jax.ShapeDtypeStruct((Bp, O), jnp.float32),
        grid=grid,
        in_specs=[
            # Activations stream over batch; last dim = full array dim (legal,
            # Mosaic pads inside the vreg at DMA time — no HBM-side padding).
            pl.BlockSpec((Bt, L), lambda i: (i, 0)),
            # Weights / biases: full-array blocks, index (0,0) -> VMEM-resident
            # across all grid steps (no re-fetch).
            pl.BlockSpec((L, H), lambda i: (0, 0)),
            pl.BlockSpec((1, H), lambda i: (0, 0)),
            pl.BlockSpec((H, O), lambda i: (0, 0)),
            pl.BlockSpec((1, O), lambda i: (0, 0)),
        ],
        # Unpadded output block (full last dim): no inflated output traffic and
        # no external lane slice.  If profiling ever shows masked vst as the
        # binding store slot, switch back to a 128-padded lane-dense block.
        out_specs=pl.BlockSpec((Bt, O), lambda i: (i, 0)),
        compiler_params=pltpu.CompilerParams(
            dimension_semantics=("parallel",),   # shards batch across TCs (v7x)
            vmem_limit_bytes=vmem_limit,
        ),
        cost_estimate=pl.CostEstimate(
            flops=int(flops), transcendentals=0,
            bytes_accessed=int(bytes_accessed)),
    )(z_mm, w1, b1, w2, b2)

    return out_p[:B] if Bp != B else out_p


if __name__ == "__main__":
    # Small shapes consistent with the module (Decoder of a VAE).
    batch, latent_dim, hidden_dim, output_dim = 8, 16, 64, 32

    key = jax.random.PRNGKey(0)
    kz, kw1, kb1, kw2, kb2 = jax.random.split(key, 5)

    # PyTorch nn.Linear layout: W is [out_features, in_features].
    z = jax.random.normal(kz, (batch, latent_dim), dtype=jnp.float32)
    w1 = jax.random.normal(kw1, (hidden_dim, latent_dim), dtype=jnp.float32) * 0.1
    b1 = jax.random.normal(kb1, (hidden_dim,), dtype=jnp.float32) * 0.1
    w2 = jax.random.normal(kw2, (output_dim, hidden_dim), dtype=jnp.float32) * 0.1
    b2 = jax.random.normal(kb2, (output_dim,), dtype=jnp.float32) * 0.1

    # One-time parameter prep (hoisted out of the per-call path).
    # use_bf16=True is the v6e/v7x fast path; default f32 keeps 1e-5 accuracy.
    params = prepare_decoder_params(w1, b1, w2, b2, use_bf16=False)

    y = decoder_forward(z, *params)
    jax.block_until_ready(y)

    # Reference check in plain JAX (matches the PyTorch forward exactly).
    y_ref = jnp.maximum(z @ w1.T + b1, 0.0) @ w2.T + b2
    assert y.shape == (batch, output_dim), f"bad shape {y.shape}"
    assert jnp.allclose(y, y_ref, atol=1e-5), "decoder output mismatch"

    print("KERNEL_OK")
</pallas_src>

<mosaic_0001>
module attributes {stable_mosaic.version = 11 : i64} {
  func.func @decoder_kernel(%arg0: i32, %arg1: memref<8x16xf32, #tpu.memory_space<vmem>>, %arg2: memref<16x64xf32, #tpu.memory_space<vmem>>, %arg3: memref<1x64xf32, #tpu.memory_space<vmem>>, %arg4: memref<64x32xf32, #tpu.memory_space<vmem>>, %arg5: memref<1x32xf32, #tpu.memory_space<vmem>>, %arg6: memref<8x32xf32, #tpu.memory_space<vmem>>) attributes {dimension_semantics = [#tpu.dimension_semantics<parallel>], iteration_bounds = array<i64: 1>, scalar_prefetch = 0 : i64, scratch_operands = 0 : i64, tpu.core_type = #tpu.core_type<tc>, window_params = [{transform_indices = @transform_0, window_bounds = array<i64: 8, 16>}, {pipeline_mode = #tpu.pipeline_mode<synchronous>, transform_indices = @transform_1, window_bounds = array<i64: 16, 64>}, {pipeline_mode = #tpu.pipeline_mode<synchronous>, transform_indices = @transform_2, window_bounds = array<i64: 1, 64>}, {pipeline_mode = #tpu.pipeline_mode<synchronous>, transform_indices = @transform_3, window_bounds = array<i64: 64, 32>}, {pipeline_mode = #tpu.pipeline_mode<synchronous>, transform_indices = @transform_4, window_bounds = array<i64: 1, 32>}, {transform_indices = @transform_5, window_bounds = array<i64: 8, 32>}]} {
    %c0 = arith.constant 0 : index
    %c0_0 = arith.constant 0 : index
    %0 = vector.load %arg1[%c0, %c0_0] : memref<8x16xf32, #tpu.memory_space<vmem>>, vector<8x16xf32>
    %c0_1 = arith.constant 0 : index
    %c0_2 = arith.constant 0 : index
    %1 = vector.load %arg2[%c0_1, %c0_2] : memref<16x64xf32, #tpu.memory_space<vmem>>, vector<16x64xf32>
    %cst = arith.constant dense<0.000000e+00> : vector<8x64xf32>
    %2 = tpu.matmul %0, %1, %cst {dimension_numbers = #tpu.dot_dimension_numbers<[1], [0], [0], [1], [0, 0, 1, 1], [], []>} : vector<8x16xf32>, vector<16x64xf32>, vector<8x64xf32> -> vector<8x64xf32>
    %c0_3 = arith.constant 0 : index
    %c0_4 = arith.constant 0 : index
    %3 = vector.load %arg3[%c0_3, %c0_4] : memref<1x64xf32, #tpu.memory_space<vmem>>, vector<1x64xf32>
    %4 = vector.broadcast %3 : vector<1x64xf32> to vector<8x64xf32>
    %5 = arith.addf %2, %4 : vector<8x64xf32>
    %cst_5 = arith.constant 0.000000e+00 : f32
    %6 = vector.broadcast %cst_5 : f32 to vector<8x64xf32>
    %7 = arith.maximumf %5, %6 : vector<8x64xf32>
    %c0_6 = arith.constant 0 : index
    %c0_7 = arith.constant 0 : index
    %8 = vector.load %arg4[%c0_6, %c0_7] : memref<64x32xf32, #tpu.memory_space<vmem>>, vector<64x32xf32>
    %cst_8 = arith.constant dense<0.000000e+00> : vector<8x32xf32>
    %9 = tpu.matmul %7, %8, %cst_8 {dimension_numbers = #tpu.dot_dimension_numbers<[1], [0], [0], [1], [0, 0, 1, 1], [], []>} : vector<8x64xf32>, vector<64x32xf32>, vector<8x32xf32> -> vector<8x32xf32>
    %c0_9 = arith.constant 0 : index
    %c0_10 = arith.constant 0 : index
    %10 = vector.load %arg5[%c0_9, %c0_10] : memref<1x32xf32, #tpu.memory_space<vmem>>, vector<1x32xf32>
    %11 = vector.broadcast %10 : vector<1x32xf32> to vector<8x32xf32>
    %12 = arith.addf %9, %11 : vector<8x32xf32>
    %c0_11 = arith.constant 0 : index
    %c0_12 = arith.constant 0 : index
    %13 = vector.load %arg6[%c0_11, %c0_12] : memref<8x32xf32, #tpu.memory_space<vmem>>, vector<8x32xf32>
    tpu.vector_store %arg6[%c0_11, %c0_12], %12 {strides = array<i32>} : memref<8x32xf32, #tpu.memory_space<vmem>>, vector<8x32xf32>,
    return
  }
  func.func @transform_0(%arg0: i32) -> (i32, i32) {
    %c0_i32 = arith.constant 0 : i32
    %c0_i32_0 = arith.constant 0 : i32
    return %arg0, %c0_i32 : i32, i32
  }
  func.func @transform_1(%arg0: i32) -> (i32, i32) {
    %c0_i32 = arith.constant 0 : i32
    %c0_i32_0 = arith.constant 0 : i32
    %c0_i32_1 = arith.constant 0 : i32
    return %c0_i32, %c0_i32_0 : i32, i32
  }
  func.func @transform_2(%arg0: i32) -> (i32, i32) {
    %c0_i32 = arith.constant 0 : i32
    %c0_i32_0 = arith.constant 0 : i32
    %c0_i32_1 = arith.constant 0 : i32
    return %c0_i32, %c0_i32_0 : i32, i32
  }
  func.func @transform_3(%arg0: i32) -> (i32, i32) {
    %c0_i32 = arith.constant 0 : i32
    %c0_i32_0 = arith.constant 0 : i32
    %c0_i32_1 = arith.constant 0 : i32
    return %c0_i32, %c0_i32_0 : i32, i32
  }
  func.func @transform_4(%arg0: i32) -> (i32, i32) {
    %c0_i32 = arith.constant 0 : i32
    %c0_i32_0 = arith.constant 0 : i32
    %c0_i32_1 = arith.constant 0 : i32
    return %c0_i32, %c0_i32_0 : i32, i32
  }
  func.func @transform_5(%arg0: i32) -> (i32, i32) {
    %c0_i32 = arith.constant 0 : i32
    %c0_i32_0 = arith.constant 0 : i32
    return %arg0, %c0_i32 : i32, i32
  }
}

</mosaic_0001>

<bundles_post_ra>
// kernel: decoder_forward.1
= control target key start
LH: loop header
LB: loop body
LE: loop exit
PB: predicated region body
PF: predicated region fallthrough
CT: control target
= control target key end

     0   :  { %vm28_vm0 = vcmask 130048   ;;  %s211_s0 = inlined_call_operand.vmem [shape: f32[8,16], index: 0, kind: input, shape index: {}]   ;;  %s212_s1 = inlined_call_operand.vmem [shape: f32[16,64], index: 1, kind: input, shape index: {}]   ;;  %s213_s2 = inlined_call_operand.vmem [shape: f32[1,64], index: 2, kind: input, shape index: {}]   ;;  %s214_s3 = inlined_call_operand.vmem [shape: f32[64,32], index: 3, kind: input, shape index: {}]   ;;  %s215_s4 = inlined_call_operand.vmem [shape: f32[1,32], index: 4, kind: input, shape index: {}]   ;;  %s216_s5 = inlined_call_operand.hbm [shape: f32[8,32], index: 5, kind: output, shape index: {}]  }
   0x1   :  { %v23_v0 = vld [vmem:[%s212_s1 + $0x8] sm:$0xff]  ;;  %v22_v1 = vld [vmem:[%s212_s1] sm:$0xff]  ;;  %v60_v3 = vld [vmem:[%s214_s3 + $0x38] sm:$0xff] }
   0x2   :  { %46 = vmatpush.msra.mxu0 %v23_v0  ;;  %v21_v2 = vld [vmem:[%s211_s0] sm:$0xff]  ;;  %v59_v4 = vld [vmem:[%s214_s3 + $0x30] sm:$0xff]  ;;  %77 = vmatpush.msra.mxu1 %v60_v3  ;;  %v58_v5 = vld [vmem:[%s214_s3 + $0x28] sm:$0xff] }
   0x4   :  { %47 = vmatpush.msra.mxu0 %v22_v1 }
   0x5   :  { %10 = vsyncpa [#allocation3], 0  ;;  %107 = vmatmul.msk.f32.vlgmr.msra.gmra.mxu0 %vm28_vm0, %v21_v2  ;;  %78 = vmatpush.msra.mxu1 %v59_v4  ;;  %v57_v6 = vld [vmem:[%s214_s3 + $0x20] sm:$0xff]  ;;  %v56_v7 = vld [vmem:[%s214_s3 + $0x18] sm:$0xff]  ;;  %vm65_vm1 = vcmask 523264   ;;  %s138_s17 = smov [#allocation2]  }
   0x6   :  { %v55_v8 = vld [vmem:[%s214_s3 + $0x10] sm:$0xff]  ;;  %v54_v9 = vld [vmem:[%s214_s3 + $0x8] sm:$0xff]  ;;  %v53_v10 = vld [vmem:[%s214_s3] sm:$0xff]  ;;  %s96_s18 = sshll.u32 %s138_s17, 4  ;;  %s98_s3 = sshll.u32 %s216_s5, 4  ;;  %vm89_vm2 = vcmask 261120   ;;  %s97_s18 = int_to_ptr.vmem [resolvable:$true] %s96_s18  ;;  %s99_s3 = int_to_ptr.hbm [resolvable:$true] %s98_s3 }
   0x7   :  { %79 = vmatpush.msra.mxu1 %v58_v5  ;;  %v110_v11 = vld [vmem:[%s213_s2] ss:$0 sm:$0xff] }
   0x8   :  { %v111_v15 = vld [vmem:[%s215_s4] ss:$0 sm:$0xff] }
   0x9   :  { %80 = vmatpush.msra.mxu1 %v57_v6 }
   0xb   :  { %81 = vmatpush.msra.mxu1 %v56_v7 }
   0xd   :  { %82 = vmatpush.msra.mxu1 %v55_v8 }
   0xf   :  { %83 = vmatpush.msra.mxu1 %v54_v9 }
  0x11   :  { %84 = vmatpush.msra.mxu1 %v53_v10 }
  0x82   :  { %v49_v12 = vpop.f32.mrf.mxu0 }
  0x83   :  { %v50_v13 = vadd.f32 %v110_v11, %v49_v12 }
  0x85   :  { %v52_v14 = vmax.f32 %v50_v13, 0.0 }
  0x87   :  { %108 = vmatmul.msk.f32.vlgmr.msra.gmra.mxu1 %vm65_vm1, %v52_v14 }
 0x104   :  { %v86_v16 = vpop.f32.mrf.mxu1 }
 0x105   :  { %v87_v17 = vadd.f32 %v111_v15, %v86_v16 }
 0x107   :  { %90 = vst.msk [vmem:[#allocation2] sm:$0xff] %vm89_vm2, %v87_v17 }
 0x108   :  { %101 = dma.vmem_to_hbm [thread:$0]  %s97_s18, 128, %s99_s3, [#allocation3]  }
 0x109   :  { %136 = dma.done.wait [#allocation3], 128  }
 0x10a   :  { %137 = vsyncadd [#allocation3], 4294967168 }
 0x10b   :  { %106 = vsyncpa [#allocation3], 1 }

</bundles_post_ra>
